<compile_context>
chip_gen: v6e
topology: v6e:2x2x1
jax: 0.10.0
libtpu: 0.0.40
codegen_flags: <defaults>
</compile_context>

<pallas_src>
import functools

import jax
import jax.numpy as jnp
from jax.experimental import pallas as pl
from jax.experimental.pallas import tpu as pltpu


def _round_up(n, m):
    return ((n + m - 1) // m) * m


def _make_mlp_kernel(nlayers):
    assert nlayers >= 1

    def kernel(x_ref, *rest):
        w_refs, out_ref = rest[:nlayers], rest[nlayers]
        # Cast the f32 activation tile to bf16 on the VPU (free slot) so the MXU
        # sees bf16 operands with f32 accumulation.
        x = x_ref[...].astype(jnp.bfloat16)          # (tb, D)
        y = None
        for li, w_ref in enumerate(w_refs):
            # Weights are pre-transposed to (in, out): plain x @ W on the MXU.
            y = jnp.dot(x, w_ref[...], preferred_element_type=jnp.float32)
            if li + 1 < nlayers:
                x = y.astype(jnp.bfloat16)           # operand for the next layer
        tb, d = y.shape
        # Sublane-aligned (8, D) partial: plain VPU adds across vregs, unmasked
        # lane-dense store.  The final (num_tiles*8, D) -> scalar sum happens
        # outside the kernel and is negligible.
        out_ref[...] = y.reshape(tb // 8, 8, d).sum(axis=0)

    return kernel


@functools.partial(jax.jit, static_argnames=("tb", "b_pad"))
def _mlp_loss_jit(x, weights, *, tb, b_pad):
    B, D = x.shape
    nlayers = len(weights)

    # Zero-pad the batch up to a multiple of the tile.  Linear layers have no
    # bias, so padded rows contribute exactly zero to the final sum.
    if b_pad != B:
        x = jnp.pad(x, ((0, b_pad - B), (0, 0)))
    num_tiles = b_pad // tb

    # One-time layout/dtype prep (weights are reused every grid step).
    wts = [w.T.astype(jnp.bfloat16) for w in weights]   # (in_features, out_features)

    # Full weight block, constant index_map -> fetched once across the grid.
    # TODO(synk): pipeline_mode=pl.Buffered(1) + vmem_limit_bytes when D grows.
    w_spec = pl.BlockSpec((D, D), lambda i: (0, 0))

    partials = pl.pallas_call(
        _make_mlp_kernel(nlayers),
        out_shape=jax.ShapeDtypeStruct((num_tiles * 8, D), jnp.float32),
        grid_spec=pltpu.PrefetchScalarGridSpec(
            num_scalar_prefetch=0,
            grid=(num_tiles,),
            in_specs=[pl.BlockSpec((tb, D), lambda i: (i, 0))] + [w_spec] * nlayers,
            out_specs=pl.BlockSpec((8, D), lambda i: (i, 0)),  # sublane-aligned partials
        ),
        compiler_params=pltpu.CompilerParams(
            # Each grid step owns its own (8, D) output block -> the batch axis
            # is truly parallel (megacore-shardable across v7x's two TCs).
            dimension_semantics=("parallel",),
        ),
    )(x, *wts)

    return jnp.sum(partials)


def mlp_loss(x, weights, *, tb=None):
    B, D = x.shape
    if tb is None:
        if B <= 512:
            # Whole (8-padded) batch in one grid step: per-step overhead (~0.35 us)
            # would dominate the few-hundred-ns of MXU work per tile otherwise.
            tb = _round_up(B, 8)
        else:
            # >=2 tiles (so v7x can use both TensorCores), capped at 1024 rows
            # per tile to keep activation VMEM modest while amortizing per-step
            # pipeline overhead.
            tb = min(1024, _round_up((B + 1) // 2, 8))
    tb = _round_up(tb, 8)
    b_pad = _round_up(B, tb)
    return _mlp_loss_jit(x, tuple(weights), tb=tb, b_pad=b_pad)


def _reference(x, weights):
    y = x.astype(jnp.float32)
    for w in weights:
        y = y @ w.astype(jnp.float32).T
    return jnp.sum(y)


if __name__ == "__main__":
    # Small shapes consistent with the module: batch=16, dim=128, nlayers=4.
    B, D, NLAYERS = 16, 128, 4

    key = jax.random.PRNGKey(0)
    kx, *kws = jax.random.split(key, 1 + NLAYERS)

    x = jax.random.normal(kx, (B, D), dtype=jnp.float32)
    bound = 1.0 / (D ** 0.5)  # torch.nn.Linear default init range
    weights = [
        jax.random.uniform(k, (D, D), dtype=jnp.float32, minval=-bound, maxval=bound)
        for k in kws
    ]

    loss = mlp_loss(x, weights)
    loss = jax.block_until_ready(loss)

    ref = _reference(x, weights)
    # bf16 MXU operands (f32 accumulation) over 4 chained layers -> loosened
    # tolerance vs. the pure-f32 reference.
    assert jnp.allclose(loss, ref, rtol=5e-2, atol=1.0), (loss, ref)

    print("KERNEL_OK")
</pallas_src>

<mosaic_0001>
module attributes {stable_mosaic.version = 11 : i64} {
  func.func @kernel(%arg0: i32, %arg1: memref<16x128xf32, #tpu.memory_space<vmem>>, %arg2: memref<128x128xbf16, #tpu.memory_space<vmem>>, %arg3: memref<128x128xbf16, #tpu.memory_space<vmem>>, %arg4: memref<128x128xbf16, #tpu.memory_space<vmem>>, %arg5: memref<128x128xbf16, #tpu.memory_space<vmem>>, %arg6: memref<8x128xf32, #tpu.memory_space<vmem>>) attributes {dimension_semantics = [#tpu.dimension_semantics<parallel>], iteration_bounds = array<i64: 1>, scalar_prefetch = 0 : i64, scratch_operands = 0 : i64, tpu.core_type = #tpu.core_type<tc>, window_params = [{transform_indices = @transform_0, window_bounds = array<i64: 16, 128>}, {pipeline_mode = #tpu.pipeline_mode<synchronous>, transform_indices = @transform_1, window_bounds = array<i64: 128, 128>}, {pipeline_mode = #tpu.pipeline_mode<synchronous>, transform_indices = @transform_2, window_bounds = array<i64: 128, 128>}, {pipeline_mode = #tpu.pipeline_mode<synchronous>, transform_indices = @transform_3, window_bounds = array<i64: 128, 128>}, {pipeline_mode = #tpu.pipeline_mode<synchronous>, transform_indices = @transform_4, window_bounds = array<i64: 128, 128>}, {transform_indices = @transform_5, window_bounds = array<i64: 8, 128>}]} {
    %c0 = arith.constant 0 : index
    %c0_0 = arith.constant 0 : index
    %0 = vector.load %arg1[%c0, %c0_0] : memref<16x128xf32, #tpu.memory_space<vmem>>, vector<16x128xf32>
    %1 = arith.truncf %0 : vector<16x128xf32> to vector<16x128xbf16>
    %c0_1 = arith.constant 0 : index
    %c0_2 = arith.constant 0 : index
    %2 = vector.load %arg2[%c0_1, %c0_2] : memref<128x128xbf16, #tpu.memory_space<vmem>>, vector<128x128xbf16>
    %cst = arith.constant dense<0.000000e+00> : vector<16x128xf32>
    %3 = tpu.matmul %1, %2, %cst {dimension_numbers = #tpu.dot_dimension_numbers<[1], [0], [0], [1], [0, 0, 1, 1], [], []>} : vector<16x128xbf16>, vector<128x128xbf16>, vector<16x128xf32> -> vector<16x128xf32>
    %4 = arith.truncf %3 : vector<16x128xf32> to vector<16x128xbf16>
    %c0_3 = arith.constant 0 : index
    %c0_4 = arith.constant 0 : index
    %5 = vector.load %arg3[%c0_3, %c0_4] : memref<128x128xbf16, #tpu.memory_space<vmem>>, vector<128x128xbf16>
    %cst_5 = arith.constant dense<0.000000e+00> : vector<16x128xf32>
    %6 = tpu.matmul %4, %5, %cst_5 {dimension_numbers = #tpu.dot_dimension_numbers<[1], [0], [0], [1], [0, 0, 1, 1], [], []>} : vector<16x128xbf16>, vector<128x128xbf16>, vector<16x128xf32> -> vector<16x128xf32>
    %7 = arith.truncf %6 : vector<16x128xf32> to vector<16x128xbf16>
    %c0_6 = arith.constant 0 : index
    %c0_7 = arith.constant 0 : index
    %8 = vector.load %arg4[%c0_6, %c0_7] : memref<128x128xbf16, #tpu.memory_space<vmem>>, vector<128x128xbf16>
    %cst_8 = arith.constant dense<0.000000e+00> : vector<16x128xf32>
    %9 = tpu.matmul %7, %8, %cst_8 {dimension_numbers = #tpu.dot_dimension_numbers<[1], [0], [0], [1], [0, 0, 1, 1], [], []>} : vector<16x128xbf16>, vector<128x128xbf16>, vector<16x128xf32> -> vector<16x128xf32>
    %10 = arith.truncf %9 : vector<16x128xf32> to vector<16x128xbf16>
    %c0_9 = arith.constant 0 : index
    %c0_10 = arith.constant 0 : index
    %11 = vector.load %arg5[%c0_9, %c0_10] : memref<128x128xbf16, #tpu.memory_space<vmem>>, vector<128x128xbf16>
    %cst_11 = arith.constant dense<0.000000e+00> : vector<16x128xf32>
    %12 = tpu.matmul %10, %11, %cst_11 {dimension_numbers = #tpu.dot_dimension_numbers<[1], [0], [0], [1], [0, 0, 1, 1], [], []>} : vector<16x128xbf16>, vector<128x128xbf16>, vector<16x128xf32> -> vector<16x128xf32>
    %13 = vector.shape_cast %12 : vector<16x128xf32> to vector<2x8x128xf32>
    %cst_12 = arith.constant dense<0.000000e+00> : vector<8x128xf32>
    %14 = vector.multi_reduction <add>, %13, %cst_12 [0] : vector<2x8x128xf32> to vector<8x128xf32>
    %c0_13 = arith.constant 0 : index
    %c0_14 = arith.constant 0 : index
    %15 = vector.load %arg6[%c0_13, %c0_14] : memref<8x128xf32, #tpu.memory_space<vmem>>, vector<8x128xf32>
    tpu.vector_store %arg6[%c0_13, %c0_14], %14 {strides = array<i32>} : memref<8x128xf32, #tpu.memory_space<vmem>>, vector<8x128xf32>,
    return
  }
  func.func @transform_0(%arg0: i32) -> (i32, i32) {
    %c0_i32 = arith.constant 0 : i32
    %c0_i32_0 = arith.constant 0 : i32
    return %arg0, %c0_i32 : i32, i32
  }
  func.func @transform_1(%arg0: i32) -> (i32, i32) {
    %c0_i32 = arith.constant 0 : i32
    %c0_i32_0 = arith.constant 0 : i32
    %c0_i32_1 = arith.constant 0 : i32
    return %c0_i32, %c0_i32_0 : i32, i32
  }
  func.func @transform_2(%arg0: i32) -> (i32, i32) {
    %c0_i32 = arith.constant 0 : i32
    %c0_i32_0 = arith.constant 0 : i32
    %c0_i32_1 = arith.constant 0 : i32
    return %c0_i32, %c0_i32_0 : i32, i32
  }
  func.func @transform_3(%arg0: i32) -> (i32, i32) {
    %c0_i32 = arith.constant 0 : i32
    %c0_i32_0 = arith.constant 0 : i32
    %c0_i32_1 = arith.constant 0 : i32
    return %c0_i32, %c0_i32_0 : i32, i32
  }
  func.func @transform_4(%arg0: i32) -> (i32, i32) {
    %c0_i32 = arith.constant 0 : i32
    %c0_i32_0 = arith.constant 0 : i32
    %c0_i32_1 = arith.constant 0 : i32
    return %c0_i32, %c0_i32_0 : i32, i32
  }
  func.func @transform_5(%arg0: i32) -> (i32, i32) {
    %c0_i32 = arith.constant 0 : i32
    %c0_i32_0 = arith.constant 0 : i32
    return %arg0, %c0_i32 : i32, i32
  }
}

</mosaic_0001>

<bundles_post_ra>
// kernel: _mlp_loss_jit.1
= control target key start
LH: loop header
LB: loop body
LE: loop exit
PB: predicated region body
PF: predicated region fallthrough
CT: control target
= control target key end

     0   :  { %v635_v0 = vmov 0.0   ;;  %vm636_vm0 = vmmov 0   ;;  %s812_s1 = inlined_call_operand.vmem [shape: bf16[128,128], index: 1, kind: input, shape index: {}]   ;;  %s813_s2 = inlined_call_operand.vmem [shape: bf16[128,128], index: 2, kind: input, shape index: {}]   ;;  %s814_s0 = inlined_call_operand.vmem [shape: f32[16,128], index: 0, kind: input, shape index: {}]   ;;  %s815_s3 = inlined_call_operand.vmem [shape: bf16[128,128], index: 3, kind: input, shape index: {}]   ;;  %s816_s4 = inlined_call_operand.vmem [shape: bf16[128,128], index: 4, kind: input, shape index: {}]   ;;  %s817_s5 = inlined_call_operand.vmem [shape: f32[8,128], index: 5, kind: output, shape index: {}]  }
   0x1   :  { %521 = vmatprep.subr.bf16.mxu0 %v635_v0  ;;  %v603_v1 = vld [vmem:[%s812_s1 + $0x38] sm:$0xff]   ;;  %537 = vmatprep.mubr.msk.bf16.mxu0 %vm636_vm0, %v635_v0  ;;  %v604_v2 = vld [vmem:[%s812_s1 + $0x30] sm:$0xff]   ;;  %v605_v3 = vld [vmem:[%s812_s1 + $0x28] sm:$0xff]  }
   0x2   :  { %541 = vmatprep.subr.bf16.mxu1 %v635_v0  ;;  %557 = vmatprep.mubr.msk.bf16.mxu1 %vm636_vm0, %v635_v0  ;;  %v611_v4 = vld [vmem:[%s813_s2 + $0x38] sm:$0xff]   ;;  %v606_v5 = vld [vmem:[%s812_s1 + $0x20] sm:$0xff]   ;;  %v612_v6 = vld [vmem:[%s813_s2 + $0x30] sm:$0xff]  }
   0x3   :  { %522 = vmatpush3.bf16.msra.mxu0 %v603_v1  ;;  %542 = vmatpush3.bf16.msra.mxu1 %v611_v4  ;;  %v607_v7 = vld [vmem:[%s812_s1 + $0x18] sm:$0xff]   ;;  %v613_v8 = vld [vmem:[%s813_s2 + $0x28] sm:$0xff]   ;;  %v608_v9 = vld [vmem:[%s812_s1 + $0x10] sm:$0xff]  }
   0x4   :  { %523 = vmatprep.subr.bf16.mxu0 %v635_v0  ;;  %543 = vmatprep.subr.bf16.mxu1 %v635_v0  ;;  %v614_v10 = vld [vmem:[%s813_s2 + $0x20] sm:$0xff]   ;;  %v609_v11 = vld [vmem:[%s812_s1 + $0x8] sm:$0xff]   ;;  %v615_v12 = vld [vmem:[%s813_s2 + $0x18] sm:$0xff]  }
   0x5   :  { %v610_v13 = vld [vmem:[%s812_s1] sm:$0xff]   ;;  %v22_v15 = vld [vmem:[%s814_s0 + $0x8] sm:$0xff]  ;;  %v616_v16 = vld [vmem:[%s813_s2 + $0x10] sm:$0xff]  }
   0x6   :  { %v21_v14 = vld [vmem:[%s814_s0] sm:$0xff]  ;;  %v617_v18 = vld [vmem:[%s813_s2 + $0x8] sm:$0xff]   ;;  %v619_v20 = vld [vmem:[%s815_s3 + $0x38] sm:$0xff]  }
   0x7   :  { %524 = vmatpush3.bf16.msra.mxu0 %v604_v2  ;;  %544 = vmatpush3.bf16.msra.mxu1 %v612_v6  ;;  %v23_v17 = vpack.c.bf16 %v22_v15, %v21_v14  ;;  %v618_v19 = vld [vmem:[%s813_s2] sm:$0xff]   ;;  %v620_v21 = vld [vmem:[%s815_s3 + $0x30] sm:$0xff]   ;;  %v621_v22 = vld [vmem:[%s815_s3 + $0x28] sm:$0xff]  }
   0x8   :  { %525 = vmatprep.subr.bf16.mxu0 %v635_v0  ;;  %545 = vmatprep.subr.bf16.mxu1 %v635_v0  ;;  %v622_v23 = vld [vmem:[%s815_s3 + $0x20] sm:$0xff]   ;;  %v623_v24 = vld [vmem:[%s815_s3 + $0x18] sm:$0xff]   ;;  %v624_v25 = vld [vmem:[%s815_s3 + $0x10] sm:$0xff]  }
   0x9   :  { %v625_v31 = vld [vmem:[%s815_s3 + $0x8] sm:$0xff]   ;;  %v626_v32 = vld [vmem:[%s815_s3] sm:$0xff]   ;;  %v627_v33 = vld [vmem:[%s816_s4 + $0x38] sm:$0xff]  }
   0xa   :  { %v628_v34 = vld [vmem:[%s816_s4 + $0x30] sm:$0xff]   ;;  %v629_v35 = vld [vmem:[%s816_s4 + $0x28] sm:$0xff]   ;;  %v630_v36 = vld [vmem:[%s816_s4 + $0x20] sm:$0xff]  }
   0xb   :  { %526 = vmatpush3.bf16.msra.mxu0 %v605_v3  ;;  %546 = vmatpush3.bf16.msra.mxu1 %v613_v8  ;;  %v631_v37 = vld [vmem:[%s816_s4 + $0x18] sm:$0xff]   ;;  %v632_v38 = vld [vmem:[%s816_s4 + $0x10] sm:$0xff]   ;;  %v633_v44 = vld [vmem:[%s816_s4 + $0x8] sm:$0xff]  }
   0xc   :  { %527 = vmatprep.subr.bf16.mxu0 %v635_v0  ;;  %547 = vmatprep.subr.bf16.mxu1 %v635_v0  ;;  %v634_v45 = vld [vmem:[%s816_s4] sm:$0xff]  }
   0xf   :  { %528 = vmatpush3.bf16.msra.mxu0 %v606_v5  ;;  %548 = vmatpush3.bf16.msra.mxu1 %v614_v10 }
  0x10   :  { %529 = vmatprep.subr.bf16.mxu0 %v635_v0  ;;  %549 = vmatprep.subr.bf16.mxu1 %v635_v0 }
  0x13   :  { %530 = vmatpush3.bf16.msra.mxu0 %v607_v7  ;;  %550 = vmatpush3.bf16.msra.mxu1 %v615_v12 }
  0x14   :  { %531 = vmatprep.subr.bf16.mxu0 %v635_v0  ;;  %551 = vmatprep.subr.bf16.mxu1 %v635_v0 }
  0x17   :  { %532 = vmatpush3.bf16.msra.mxu0 %v608_v9  ;;  %552 = vmatpush3.bf16.msra.mxu1 %v616_v16 }
  0x18   :  { %533 = vmatprep.subr.bf16.mxu0 %v635_v0  ;;  %553 = vmatprep.subr.bf16.mxu1 %v635_v0 }
  0x1b   :  { %534 = vmatpush3.bf16.msra.mxu0 %v609_v11  ;;  %554 = vmatpush3.bf16.msra.mxu1 %v617_v18 }
  0x1c   :  { %535 = vmatprep.subr.bf16.mxu0 %v635_v0  ;;  %555 = vmatprep.subr.bf16.mxu1 %v635_v0 }
  0x1f   :  { %536 = vmatpush3.bf16.msra.mxu0 %v610_v13  ;;  %556 = vmatpush3.bf16.msra.mxu1 %v618_v19 }
  0x20   :  { %561 = vmatprep.subr.bf16.mxu0 %v635_v0  ;;  %581 = vmatprep.subr.bf16.mxu1 %v635_v0 }
  0x22   :  { %538 = vmatmul.mubr.bf16.vlgmr.msra.gmra.mxu0 %v23_v17 }
  0x23   :  { %577 = vmatprep.mubr.msk.bf16.mxu0 %vm636_vm0, %v635_v0  ;;  %562 = vmatpush3.bf16.msra.mxu0 %v619_v20 }
  0x24   :  { %563 = vmatprep.subr.bf16.mxu0 %v635_v0 }
  0x27   :  { %564 = vmatpush3.bf16.msra.mxu0 %v620_v21 }
  0x28   :  { %565 = vmatprep.subr.bf16.mxu0 %v635_v0 }
  0x2b   :  { %566 = vmatpush3.bf16.msra.mxu0 %v621_v22 }
  0x2c   :  { %567 = vmatprep.subr.bf16.mxu0 %v635_v0 }
  0x2f   :  { %568 = vmatpush3.bf16.msra.mxu0 %v622_v23 }
  0x30   :  { %569 = vmatprep.subr.bf16.mxu0 %v635_v0 }
  0x33   :  { %570 = vmatpush3.bf16.msra.mxu0 %v623_v24 }
  0x34   :  { %571 = vmatprep.subr.bf16.mxu0 %v635_v0 }
  0x37   :  { %572 = vmatpush3.bf16.msra.mxu0 %v624_v25 }
  0x38   :  { %573 = vmatprep.subr.bf16.mxu0 %v635_v0 }
  0x3b   :  { %574 = vmatpush3.bf16.msra.mxu0 %v625_v31 }
  0x3c   :  { %575 = vmatprep.subr.bf16.mxu0 %v635_v0 }
  0x3f   :  { %576 = vmatpush3.bf16.msra.mxu0 %v626_v32 }
  0xe2   :  { %v122_v26 = vpop.f32.mrf.mxu0 }
  0xe4   :  { %v539_v27 = vpop.f32.mrf.mxu0 }
  0xe6   :  { %v125_v28 = vpop.f32.mrf.mxu0 }
  0xe7   :  { %v129_v29 = vpack.c.bf16 %v125_v28, %v122_v26 }
  0xe8   :  { %v540_v30 = vpop.f32.mrf.mxu0 }
  0xe9   :  { %558 = vmatmul.mubr.bf16.vlgmr.msra.gmra.mxu1 %v129_v29 }
  0xea   :  { %597 = vmatprep.mubr.msk.bf16.mxu1 %vm636_vm0, %v635_v0  ;;  %582 = vmatpush3.bf16.msra.mxu1 %v627_v33 }
  0xeb   :  { %583 = vmatprep.subr.bf16.mxu1 %v635_v0 }
  0xee   :  { %584 = vmatpush3.bf16.msra.mxu1 %v628_v34 }
  0xef   :  { %585 = vmatprep.subr.bf16.mxu1 %v635_v0 }
  0xf2   :  { %586 = vmatpush3.bf16.msra.mxu1 %v629_v35 }
  0xf3   :  { %587 = vmatprep.subr.bf16.mxu1 %v635_v0 }
  0xf6   :  { %588 = vmatpush3.bf16.msra.mxu1 %v630_v36 }
  0xf7   :  { %589 = vmatprep.subr.bf16.mxu1 %v635_v0 }
  0xfa   :  { %590 = vmatpush3.bf16.msra.mxu1 %v631_v37 }
  0xfb   :  { %591 = vmatprep.subr.bf16.mxu1 %v635_v0 }
  0xfe   :  { %592 = vmatpush3.bf16.msra.mxu1 %v632_v38 }
  0xff   :  { %593 = vmatprep.subr.bf16.mxu1 %v635_v0 }
 0x102   :  { %594 = vmatpush3.bf16.msra.mxu1 %v633_v44 }
 0x103   :  { %595 = vmatprep.subr.bf16.mxu1 %v635_v0 }
 0x106   :  { %596 = vmatpush3.bf16.msra.mxu1 %v634_v45 }
 0x1a9   :  { %v228_v39 = vpop.f32.mrf.mxu1 }
 0x1ab   :  { %v559_v40 = vpop.f32.mrf.mxu1 }
 0x1ad   :  { %v231_v41 = vpop.f32.mrf.mxu1 }
 0x1ae   :  { %v235_v42 = vpack.c.bf16 %v231_v41, %v228_v39 }
 0x1af   :  { %v560_v43 = vpop.f32.mrf.mxu1 }
 0x1b0   :  { %578 = vmatmul.mubr.bf16.vlgmr.msra.gmra.mxu0 %v235_v42 }
 0x270   :  { %v334_v46 = vpop.f32.mrf.mxu0 }
 0x272   :  { %v579_v47 = vpop.f32.mrf.mxu0 }
 0x274   :  { %v337_v48 = vpop.f32.mrf.mxu0 }
 0x275   :  { %v341_v49 = vpack.c.bf16 %v337_v48, %v334_v46 }
 0x276   :  { %v580_v50 = vpop.f32.mrf.mxu0 }
 0x277   :  { %598 = vmatmul.mubr.bf16.vlgmr.msra.gmra.mxu1 %v341_v49 }
 0x337   :  { %v440_v51 = vpop.f32.mrf.mxu1 }
 0x339   :  { %v599_v52 = vpop.f32.mrf.mxu1 }
 0x33b   :  { %v443_v53 = vpop.f32.mrf.mxu1 }
 0x33c   :  { %v447_v54 = vadd.f32 %v443_v53, %v440_v51 }
 0x33d   :  { %v600_v55 = vpop.f32.mrf.mxu1 }
 0x33e   :  { %448 = vst [vmem:[%s817_s5] sm:$0xff] %v447_v54 }

</bundles_post_ra>
